<compile_context>
chip_gen: v5e
topology: v5e:2x2
jax: 0.10.0
libtpu: 0.0.40
codegen_flags: <defaults>
</compile_context>

<pallas_src>
import functools

import jax
import jax.numpy as jnp
from jax.experimental import pallas as pl
from jax.experimental.pallas import tpu as pltpu

_MIB = 1024 * 1024


def _vmem_capacity_bytes():
    try:
        return int(pltpu.get_tpu_info().vmem_capacity_bytes)
    except Exception:
        return 128 * _MIB  # v5e/v6e default


# ---------------------------------------------------------------------------
# Fused single-pass kernel: pool -> FC1+ReLU -> FC2+sigmoid -> scale, one block
# per (bt, C, HW) batch tile.
# ---------------------------------------------------------------------------
def se_fused_kernel(x_ref, w1t_ref, b1_ref, w2t_ref, b2_ref, o_ref, *, inv_hw):
    # squeeze: AdaptiveAvgPool2d((1,1)) == mean over the lane-dense spatial axis.
    pooled = jnp.sum(x_ref[...], axis=-1, dtype=jnp.float32) * inv_hw        # (Bt, C)

    # compress: 1x1 conv on (1,1) spatial == dense layer (weight pre-transposed
    # and pre-cast in the wrapper -> native MXU dtype path).
    h = jnp.dot(pooled.astype(w1t_ref.dtype), w1t_ref[...],
                preferred_element_type=jnp.float32) + b1_ref[...]
    h = jnp.maximum(h, 0.0)                                                   # (Bt, Cr)

    # excitation: 1x1 conv + sigmoid.
    z = jnp.dot(h.astype(w2t_ref.dtype), w2t_ref[...],
                preferred_element_type=jnp.float32) + b2_ref[...]
    gate = jax.nn.sigmoid(z)                                                  # (Bt, C)

    # scale: re-read the x tile (not held live across the FC section), multiply
    # in the output dtype.
    o_ref[...] = x_ref[...] * gate.astype(o_ref.dtype)[:, :, None]


# ---------------------------------------------------------------------------
# Two-pass fallback (one sample does not fit the block budget).
# Pass 1: pooled sum over spatial chunks (f32 scratch) + FCs + sigmoid -> gate.
# Pass 2: elementwise scale, streamed by spatial chunk.
# ---------------------------------------------------------------------------
def _pool_fc_kernel(x_ref, w1t_ref, b1_ref, w2t_ref, b2_ref, s_ref, acc_ref, *, hw):
    sidx = pl.program_id(1)
    hwc = x_ref.shape[-1]

    @pl.when(sidx == 0)
    def _():
        acc_ref[...] = jnp.zeros_like(acc_ref)

    # Mask lanes past the real spatial extent (ragged last chunk).
    lane = jax.lax.broadcasted_iota(jnp.int32, x_ref.shape, dimension=2)
    valid = (lane + sidx * hwc) < hw
    xb = jnp.where(valid, x_ref[...].astype(jnp.float32), 0.0)
    acc_ref[...] += jnp.sum(xb, axis=-1)                                      # (1, C)

    @pl.when(sidx == pl.num_programs(1) - 1)
    def _():
        pooled = acc_ref[...] * (1.0 / hw)                                    # (1, C)
        h = jnp.dot(pooled.astype(w1t_ref.dtype), w1t_ref[...],
                    preferred_element_type=jnp.float32) + b1_ref[...]
        h = jnp.maximum(h, 0.0)
        z = jnp.dot(h.astype(w2t_ref.dtype), w2t_ref[...],
                    preferred_element_type=jnp.float32) + b2_ref[...]
        s_ref[...] = jax.nn.sigmoid(z).astype(s_ref.dtype)[:, None, :]        # (1,1,C)


def _scale_kernel(x_ref, s_ref, o_ref):
    # x: (1, C, HWc), s: (1, C, 1) -> broadcast multiply.
    o_ref[...] = x_ref[...] * s_ref[...]


def _se_forward_two_pass(x3, w1t, b1_2d, w2t, b2_2d, hw, block_budget, vmem_cap,
                         weight_bytes):
    B, C, HW = x3.shape
    Cr = w1t.shape[1]
    itemsize = x3.dtype.itemsize

    hwc = max(128, (block_budget // max(1, C * itemsize)) // 128 * 128)
    hwc = min(hwc, ((HW + 127) // 128) * 128)
    n_chunks = pl.cdiv(HW, hwc)
    block_bytes = C * hwc * itemsize
    vmem_limit = int(min(int(vmem_cap * 0.75),
                         max(4 * block_bytes + 2 * weight_bytes + 2 * _MIB,
                             16 * _MIB)))

    # Pass 1: gate = sigmoid(FC2(relu(FC1(mean(x)))))  -> (B, 1, C)
    gate = pl.pallas_call(
        functools.partial(_pool_fc_kernel, hw=hw),
        out_shape=jax.ShapeDtypeStruct((B, 1, C), x3.dtype),
        grid_spec=pltpu.PrefetchScalarGridSpec(
            num_scalar_prefetch=0,
            grid=(B, n_chunks),
            in_specs=[
                pl.BlockSpec((1, C, hwc), lambda b, s: (b, 0, s)),
                pl.BlockSpec((C, Cr), lambda b, s: (0, 0)),
                pl.BlockSpec((1, Cr), lambda b, s: (0, 0)),
                pl.BlockSpec((Cr, C), lambda b, s: (0, 0)),
                pl.BlockSpec((1, C), lambda b, s: (0, 0)),
            ],
            out_specs=pl.BlockSpec((1, 1, C), lambda b, s: (b, 0, 0)),
            scratch_shapes=[pltpu.VMEM((1, C), jnp.float32)],
        ),
        compiler_params=pltpu.CompilerParams(
            dimension_semantics=("parallel", "arbitrary"),
            vmem_limit_bytes=vmem_limit,
        ),
    )(x3, w1t, b1_2d, w2t, b2_2d)

    gate_c = jnp.transpose(gate, (0, 2, 1))  # (B, C, 1) -- tiny wrapper-side op

    # Pass 2: out = x * gate, streamed by spatial chunk.
    out3 = pl.pallas_call(
        _scale_kernel,
        out_shape=jax.ShapeDtypeStruct((B, C, HW), x3.dtype),
        grid_spec=pltpu.PrefetchScalarGridSpec(
            num_scalar_prefetch=0,
            grid=(B, n_chunks),
            in_specs=[
                pl.BlockSpec((1, C, hwc), lambda b, s: (b, 0, s)),
                pl.BlockSpec((1, C, 1), lambda b, s: (b, 0, 0)),
            ],
            out_specs=pl.BlockSpec((1, C, hwc), lambda b, s: (b, 0, s)),
        ),
        compiler_params=pltpu.CompilerParams(
            dimension_semantics=("parallel", "parallel"),
            vmem_limit_bytes=vmem_limit,
        ),
    )(x3, gate_c)
    return out3


# ---------------------------------------------------------------------------
# Wrapper
# ---------------------------------------------------------------------------
def se_forward(x, w1, b1, w2, b2, *, block_budget_bytes=None, donate_x=False):
    """SE forward. x: (B, C, H, W); w1: (Cr, C); b1: (Cr,); w2: (C, Cr); b2: (C,)."""
    B, C, H, W = x.shape
    Cr = w1.shape[0]
    HW = H * W
    itemsize = x.dtype.itemsize

    # Lane-dense view of the spatial axis -- no materializing pad; the full HW
    # extent is used as the last block dim (block dim == array dim).
    x3 = x.reshape(B, C, HW)

    # Pre-transpose + pre-cast weights once in the wrapper (MXU-friendly, no
    # per-grid-step transpose / cast inside the kernel); biases in f32.
    w1t = jnp.asarray(w1).T.astype(x.dtype)                 # (C, Cr)
    w2t = jnp.asarray(w2).T.astype(x.dtype)                 # (Cr, C)
    b1_2d = jnp.asarray(b1).reshape(1, Cr).astype(jnp.float32)
    b2_2d = jnp.asarray(b2).reshape(1, C).astype(jnp.float32)

    vmem_cap = _vmem_capacity_bytes()
    # Generation-aware block budget: ~8 MiB on 128 MiB VMEM (v5e/v6e), ~4 MiB
    # on v7x (64 MiB); block is double-buffered for both input and output.
    block_budget = block_budget_bytes
    if block_budget is None:
        block_budget = max(1 * _MIB, vmem_cap // 16)

    weight_bytes = ((w1t.size + w2t.size) * w1t.dtype.itemsize
                    + (b1_2d.size + b2_2d.size) * 4)
    bytes_per_sample = C * HW * itemsize

    if bytes_per_sample > block_budget:
        # One sample exceeds the fused block budget -> robust two-pass path
        # (3x|x| HBM traffic instead of VMEM OOM).
        out3 = _se_forward_two_pass(x3, w1t, b1_2d, w2t, b2_2d, HW,
                                    block_budget, vmem_cap, weight_bytes)
        return out3.reshape(B, C, H, W)

    # Batch tile: a divisor of B (no batch padding / output slice). Keep >= 2
    # grid steps when possible so the parallel batch axis shards across both
    # TensorCores on v7x.
    divisors = [d for d in range(1, B + 1) if B % d == 0]
    feasible = [d for d in divisors if d * bytes_per_sample <= block_budget]
    multi = [d for d in feasible if B // d >= 2]
    bt = max(multi) if multi else max(feasible)
    n_steps = B // bt

    block_bytes = bt * bytes_per_sample
    vmem_limit = int(min(int(vmem_cap * 0.75),
                         max(4 * block_bytes + 2 * weight_bytes + 2 * _MIB,
                             16 * _MIB)))

    cost = pl.CostEstimate(
        flops=int(2 * B * C * HW + 4 * B * C * Cr),          # pool + scale + FCs
        transcendentals=int(B * C),                          # sigmoid
        bytes_accessed=int(2 * B * C * HW * itemsize + weight_bytes),
    )

    out3 = pl.pallas_call(
        functools.partial(se_fused_kernel, inv_hw=1.0 / HW),
        out_shape=jax.ShapeDtypeStruct((B, C, HW), x.dtype),
        grid_spec=pltpu.PrefetchScalarGridSpec(
            num_scalar_prefetch=0,
            grid=(n_steps,),
            in_specs=[
                pl.BlockSpec((bt, C, HW), lambda b: (b, 0, 0)),
                pl.BlockSpec((C, Cr), lambda b: (0, 0)),
                pl.BlockSpec((1, Cr), lambda b: (0, 0)),
                pl.BlockSpec((Cr, C), lambda b: (0, 0)),
                pl.BlockSpec((1, C), lambda b: (0, 0)),
            ],
            out_specs=pl.BlockSpec((bt, C, HW), lambda b: (b, 0, 0)),
        ),
        compiler_params=pltpu.CompilerParams(
            dimension_semantics=("parallel",),
            vmem_limit_bytes=vmem_limit,
        ),
        cost_estimate=cost,
        input_output_aliases=({0: 0} if donate_x else {}),
    )(x3, w1t, b1_2d, w2t, b2_2d)

    return out3.reshape(B, C, H, W)


def se_reference(x, w1, b1, w2, b2):
    pooled = jnp.mean(x, axis=(2, 3))                        # (B, C)
    h = jnp.maximum(pooled @ w1.T + b1, 0.0)                 # (B, Cr)
    s = jax.nn.sigmoid(h @ w2.T + b2)                        # (B, C)
    return x * s[:, :, None, None]


if __name__ == "__main__":
    B, C, H, W = 2, 4, 16, 16
    ratio = 2
    Cr = C // ratio

    key = jax.random.PRNGKey(0)
    kx, k1, k2, k3, k4 = jax.random.split(key, 5)

    x = jax.random.normal(kx, (B, C, H, W), dtype=jnp.float32)
    # 1x1 conv weights squeezed to 2D (kernel size is 1x1):
    w1 = jax.random.normal(k1, (Cr, C), dtype=jnp.float32) * 0.1
    b1 = jax.random.normal(k2, (Cr,), dtype=jnp.float32) * 0.1
    w2 = jax.random.normal(k3, (C, Cr), dtype=jnp.float32) * 0.1
    b2 = jax.random.normal(k4, (C,), dtype=jnp.float32) * 0.1

    ref = se_reference(x, w1, b1, w2, b2)

    # Fused single-pass path.
    out = jax.block_until_ready(se_forward(x, w1, b1, w2, b2))
    assert out.shape == (B, C, H, W)
    assert jnp.allclose(out, ref, atol=1e-5, rtol=1e-5)

    # Two-pass fallback path (forced via a tiny block budget) -- exercises the
    # oversized-sample robustness path at small shapes.
    out2 = jax.block_until_ready(
        se_forward(x, w1, b1, w2, b2, block_budget_bytes=1024))
    assert jnp.allclose(out2, ref, atol=1e-5, rtol=1e-5)

    print("KERNEL_OK")
</pallas_src>

<mosaic_0001>
module attributes {stable_mosaic.version = 11 : i64} {
  func.func @se_fused_kernel(%arg0: i32, %arg1: memref<1x4x256xf32, #tpu.memory_space<vmem>>, %arg2: memref<4x2xf32, #tpu.memory_space<vmem>>, %arg3: memref<1x2xf32, #tpu.memory_space<vmem>>, %arg4: memref<2x4xf32, #tpu.memory_space<vmem>>, %arg5: memref<1x4xf32, #tpu.memory_space<vmem>>, %arg6: memref<1x4x256xf32, #tpu.memory_space<vmem>>) attributes {dimension_semantics = [#tpu.dimension_semantics<parallel>], iteration_bounds = array<i64: 2>, scalar_prefetch = 0 : i64, scratch_operands = 0 : i64, tpu.core_type = #tpu.core_type<tc>, window_params = [{transform_indices = @transform_0, window_bounds = array<i64: 1, 4, 256>}, {pipeline_mode = #tpu.pipeline_mode<synchronous>, transform_indices = @transform_1, window_bounds = array<i64: 4, 2>}, {pipeline_mode = #tpu.pipeline_mode<synchronous>, transform_indices = @transform_2, window_bounds = array<i64: 1, 2>}, {pipeline_mode = #tpu.pipeline_mode<synchronous>, transform_indices = @transform_3, window_bounds = array<i64: 2, 4>}, {pipeline_mode = #tpu.pipeline_mode<synchronous>, transform_indices = @transform_4, window_bounds = array<i64: 1, 4>}, {transform_indices = @transform_5, window_bounds = array<i64: 1, 4, 256>}]} {
    %c0 = arith.constant 0 : index
    %c0_0 = arith.constant 0 : index
    %c0_1 = arith.constant 0 : index
    %0 = vector.load %arg1[%c0, %c0_0, %c0_1] : memref<1x4x256xf32, #tpu.memory_space<vmem>>, vector<1x4x256xf32>
    %cst = arith.constant dense<0.000000e+00> : vector<1x4xf32>
    %1 = vector.multi_reduction <add>, %0, %cst [2] : vector<1x4x256xf32> to vector<1x4xf32>
    %cst_2 = arith.constant 3.906250e-03 : f32
    %2 = vector.broadcast %cst_2 : f32 to vector<1x4xf32>
    %3 = arith.mulf %1, %2 : vector<1x4xf32>
    %c0_3 = arith.constant 0 : index
    %c0_4 = arith.constant 0 : index
    %4 = vector.load %arg2[%c0_3, %c0_4] : memref<4x2xf32, #tpu.memory_space<vmem>>, vector<4x2xf32>
    %cst_5 = arith.constant dense<0.000000e+00> : vector<1x2xf32>
    %5 = tpu.matmul %3, %4, %cst_5 {dimension_numbers = #tpu.dot_dimension_numbers<[1], [0], [0], [1], [0, 0, 1, 1], [], []>} : vector<1x4xf32>, vector<4x2xf32>, vector<1x2xf32> -> vector<1x2xf32>
    %c0_6 = arith.constant 0 : index
    %c0_7 = arith.constant 0 : index
    %6 = vector.load %arg3[%c0_6, %c0_7] : memref<1x2xf32, #tpu.memory_space<vmem>>, vector<1x2xf32>
    %7 = arith.addf %5, %6 : vector<1x2xf32>
    %cst_8 = arith.constant 0.000000e+00 : f32
    %8 = vector.broadcast %cst_8 : f32 to vector<1x2xf32>
    %9 = arith.maximumf %7, %8 : vector<1x2xf32>
    %c0_9 = arith.constant 0 : index
    %c0_10 = arith.constant 0 : index
    %10 = vector.load %arg4[%c0_9, %c0_10] : memref<2x4xf32, #tpu.memory_space<vmem>>, vector<2x4xf32>
    %cst_11 = arith.constant dense<0.000000e+00> : vector<1x4xf32>
    %11 = tpu.matmul %9, %10, %cst_11 {dimension_numbers = #tpu.dot_dimension_numbers<[1], [0], [0], [1], [0, 0, 1, 1], [], []>} : vector<1x2xf32>, vector<2x4xf32>, vector<1x4xf32> -> vector<1x4xf32>
    %c0_12 = arith.constant 0 : index
    %c0_13 = arith.constant 0 : index
    %12 = vector.load %arg5[%c0_12, %c0_13] : memref<1x4xf32, #tpu.memory_space<vmem>>, vector<1x4xf32>
    %13 = arith.addf %11, %12 : vector<1x4xf32>
    %14 = arith.negf %13 : vector<1x4xf32>
    %15 = math.exp %14 : vector<1x4xf32>
    %cst_14 = arith.constant 1.000000e+00 : f32
    %16 = vector.broadcast %cst_14 : f32 to vector<1x4xf32>
    %17 = arith.addf %16, %15 : vector<1x4xf32>
    %18 = arith.divf %16, %17 : vector<1x4xf32>
    %c0_15 = arith.constant 0 : index
    %c0_16 = arith.constant 0 : index
    %c0_17 = arith.constant 0 : index
    %19 = vector.load %arg1[%c0_15, %c0_16, %c0_17] : memref<1x4x256xf32, #tpu.memory_space<vmem>>, vector<1x4x256xf32>
    %20 = vector.shape_cast %18 : vector<1x4xf32> to vector<1x4x1xf32>
    %21 = vector.broadcast %20 : vector<1x4x1xf32> to vector<1x4x256xf32>
    %22 = arith.mulf %19, %21 : vector<1x4x256xf32>
    %c0_18 = arith.constant 0 : index
    %c0_19 = arith.constant 0 : index
    %c0_20 = arith.constant 0 : index
    %23 = vector.load %arg6[%c0_18, %c0_19, %c0_20] : memref<1x4x256xf32, #tpu.memory_space<vmem>>, vector<1x4x256xf32>
    tpu.vector_store %arg6[%c0_18, %c0_19, %c0_20], %22 {strides = array<i32>} : memref<1x4x256xf32, #tpu.memory_space<vmem>>, vector<1x4x256xf32>,
    return
  }
  func.func @transform_0(%arg0: i32) -> (i32, i32, i32) {
    %c0_i32 = arith.constant 0 : i32
    %c0_i32_0 = arith.constant 0 : i32
    %c0_i32_1 = arith.constant 0 : i32
    return %arg0, %c0_i32, %c0_i32_0 : i32, i32, i32
  }
  func.func @transform_1(%arg0: i32) -> (i32, i32) {
    %c0_i32 = arith.constant 0 : i32
    %c0_i32_0 = arith.constant 0 : i32
    %c0_i32_1 = arith.constant 0 : i32
    return %c0_i32, %c0_i32_0 : i32, i32
  }
  func.func @transform_2(%arg0: i32) -> (i32, i32) {
    %c0_i32 = arith.constant 0 : i32
    %c0_i32_0 = arith.constant 0 : i32
    %c0_i32_1 = arith.constant 0 : i32
    return %c0_i32, %c0_i32_0 : i32, i32
  }
  func.func @transform_3(%arg0: i32) -> (i32, i32) {
    %c0_i32 = arith.constant 0 : i32
    %c0_i32_0 = arith.constant 0 : i32
    %c0_i32_1 = arith.constant 0 : i32
    return %c0_i32, %c0_i32_0 : i32, i32
  }
  func.func @transform_4(%arg0: i32) -> (i32, i32) {
    %c0_i32 = arith.constant 0 : i32
    %c0_i32_0 = arith.constant 0 : i32
    %c0_i32_1 = arith.constant 0 : i32
    return %c0_i32, %c0_i32_0 : i32, i32
  }
  func.func @transform_5(%arg0: i32) -> (i32, i32, i32) {
    %c0_i32 = arith.constant 0 : i32
    %c0_i32_0 = arith.constant 0 : i32
    %c0_i32_1 = arith.constant 0 : i32
    return %arg0, %c0_i32, %c0_i32_0 : i32, i32, i32
  }
}

</mosaic_0001>

<bundles_post_ra>
// kernel: tpu_custom_call.1
= control target key start
LH: loop header
LB: loop body
LE: loop exit
PB: predicated region body
PF: predicated region fallthrough
CT: control target
= control target key end

     0   :  { %10 = vsyncpa [#allocation3], 0  ;;  %s790_s0 = inlined_call_operand.hbm [shape: f32[2,4,256], index: 0, kind: input, shape index: {}]   ;;  %s791_s1 = inlined_call_operand.vmem [shape: f32[4,2], index: 1, kind: input, shape index: {}]   ;;  %s792_s2 = inlined_call_operand.vmem [shape: f32[1,2], index: 2, kind: input, shape index: {}]   ;;  %s793_s3 = inlined_call_operand.vmem [shape: f32[2,4], index: 3, kind: input, shape index: {}]   ;;  %s794_s4 = inlined_call_operand.vmem [shape: f32[1,4], index: 4, kind: input, shape index: {}]   ;;  %s795_s5 = inlined_call_operand.hbm [shape: f32[2,4,256], index: 5, kind: output, shape index: {}]  }
   0x1   :  { %12 = vsyncpa [#allocation3 + $0x1], 0 }
   0x2   :  { %13 = vsyncpa [#allocation4], 0 }
   0x3   :  { %15 = vsyncpa [#allocation4 + $0x1], 0  ;;  %s643_s18 = smov 0   ;;  %s645_s19 = smov 0  }
   0x4   :  { %s647_s20 = smov 0   ;;  %s649_s21 = smov 0  }
   0x5 LB: > { %s664_s22 = sadd.s32 4294967295, %s610_s21   ;;  %s441_s23 = sadd.s32 4294967294, %s610_s21   ;;  %s610_s21 = sphi %s649_s21, %s805_s21   ;;  %s606_s20 = sphi %s647_s20, %s804_s20   ;;  %s602_s19 = sphi %s645_s19, %s803_s19   ;;  %s598_s18 = sphi %s643_s18, %s802_s18  }
   0x6   : > { %s668_s24 = sadd.s32 1, %s610_s21   ;;  %s28_s25 = sadd.s32 1, %s606_s20 }
   0x7   : > { %s25_s26 = ssub.s32 %s610_s21, %s668_s24  ;;  %p35_p0 = scmp.ne.s32.totalorder %s606_s20, %s602_s19 }
   0x8   : > { %p26_p1 = scmp.eq.s32.totalorder %s25_s26, 0  ;;  %p36_p2 = scmp.eq.s32.totalorder %s610_s21, 0 }
   0x9   : > { %p41_p3 = scmp.ne.s32.totalorder %s602_s19, %s598_s18  ;;  %p42_p4 = scmp.eq.s32.totalorder %s664_s22, 0 }
   0xa   : > { %s680_s27 = scalar_select %p26_p1, %s606_s20, %s28_s25  }
   0xb   : > { %p682_p5 = por %p36_p2, %p35_p0  ;;  %p686_p6 = por %p42_p4, %p41_p3 }
   0xc   : > { %p149_p7 = scmp.eq.s32.totalorder %s664_s22, 1  ;;  %p155_p8 = scmp.eq.s32.totalorder %s441_s23, 1 }
   0xd   : > { %p474_p10 = scmp.lt.s32.totalorder %s610_s21, 2  ;;  %s187_s7 = sand.u32 1, %s606_s20  }
   0xe   : > { %p693_p11 = por %p149_p7, %p35_p0  ;;  %p697_p12 = por %p155_p8, %p41_p3 }
   0xf   : > { %s460_s8 = sshll.u32 %s610_s21, 3  ;;  %s444_s9 = sshll.u32 %s187_s7, 3 }
  0x10   : > { %s196_s12 = scalar_lea.hbm %s790_s0, %s460_s8  ;;  %s191_s14 = scalar_lea.vmem [#allocation2], %s444_s9 }
  0x11   : > { %s198_s13 = sshll.u32 %s196_s12, 4  ;;  %s200_s15 = sshll.u32 %s191_s14, 4  ;;  %s199_s13 = int_to_ptr.hbm [resolvable:$true] %s198_s13  ;;  %s201_s15 = int_to_ptr.vmem [resolvable:$true] %s200_s15 }
  0x12   : > { %p708_p13 = pnand %p474_p10, %p682_p5  ;;  %p447_p0 = scmp.ge.s32.totalorder %s610_s21, 1 }
  0x13   : > { %p205_p1 = scmp.lt.s32.totalorder %s610_s21, 3  ;;  %s188_s17 = scalar_lea.sflag [#allocation3], %s187_s7 }
  0x14   : > { %s514_s23 = sshra.s32 %s199_s13, 4  ;;  %p518_p3 = pneg %p708_p13  ;;  %s515_s23 = int_to_ptr.hbm [resolvable:$true] %s514_s23 }
  0x15   : > { %s516_s25 = scalar_lea.hbm %s515_s23, 8  ;;  %s521_s28 = scalar_lea.hbm %s790_s0, 16 }
  0x16   : > { %p517_p2 = scmp.ne.s32.totalorder %s515_s23, %s516_s25  ;;  %p522_p5 = scmp.lt.s32.totalorder %s515_s23, %s790_s0 }
  0x17   : > { %p523_p8 = scmp.lt.s32.totalorder %s521_s28, %s516_s25 }
  0x18   : > { %p519_p4 = pnand %p518_p3, %p517_p2 }
  0x19   : > { %p524_p10 = por %p523_p8, %p522_p5 }
  0x1a   : > { %p520_p7 = pneg %p519_p4 }
  0x1c   : > { %p525_p9 = pnand %p524_p10, %p520_p7 }
  0x1e   : > { %528 = shalt.err (!%p525_p9)
}
  0x1f   : > { %469 = dma.hbm_to_vmem [thread:$0]  (!%p708_p13), %s199_s13, 128, %s201_s15, %s188_s17  }
  0x20   : > { %p206_p2 = pnand %p447_p0, %p205_p1 }
  0x21   : > { %s729_s7 = sand.u32 (!%p206_p2), 1, %s602_s19  }
  0x22   : > { %209 = sbr.rel (%p206_p2) target bundleno = 582 (0x246), region = 40  ;;  %s448_s11 = sshll.u32 (!%p206_p2), %s729_s7, 3 }
  0x23   : > { %s212_s12 = scalar_lea.sflag (!%p206_p2), [#allocation3], %s729_s7  ;;  %s215_s14 = scalar_lea.vmem (!%p206_p2), [#allocation2], %s448_s11 }
  0x27   : > { %589 = dma.done.wait (%p686_p6), %s212_s12, 128  }
  0x28   : > { %591 = vsyncadd (%p686_p6), %s212_s12, 4294967168  ;;  %v739_v0 = vld [vmem:[%s215_s14] sm:$0xff]  ;;  %vm250_vm0 = vcmask 1043456   ;;  %v257_v6 = vld [vmem:[%s791_s1] sm:$0xf]  ;;  %v260_v7 = vlaneseq  ;;  %vm263_vm1 = vcmask 31744  }
  0x29   : > { %245 = vst [vmem:[#allocation1] ss:$2 sm:$0xff] %v739_v0  ;;  %450 = vmatpush.msk.msra.mxu0 %vm250_vm0, %v257_v6  ;;  %v290_v12 = vld [vmem:[%s793_s3] sm:$0x3]  ;;  %vm296_vm2 = vcmask 1041408   ;;  %vm292_vm3 = vcmask 15360  }
  0x2a   : > { %v261_v8 = vand.u32 127, %v260_v7  ;;  %452 = vmatpush.msk.msra.mxu1 %vm296_vm2, %v290_v12  ;;  %v258_v13 = vld [vmem:[%s792_s2] sm:$0x1]  ;;  %v341_v17 = vshrl.u32 %v260_v7, 7  ;;  %v612_v35 = vmov 839922192  }
  0x2b   : > { %v291_v18 = vld [vmem:[%s794_s4] sm:$0x1]  ;;  %v348_v36 = vunpack.c.l.s4 %v612_v35  ;;  %s461_s8 = sshll.u32 %s664_s22, 3  ;;  %s242_s12 = scalar_lea.vmem [#allocation5], %s448_s11 }
  0x2c   : > { %509 = vset.pattern.permute.xlu0 %v341_v17  ;;  %s366_s10 = scalar_lea.hbm %s795_s5, %s461_s8  ;;  %s368_s14 = sshll.u32 %s242_s12, 4  ;;  %s369_s14 = int_to_ptr.vmem [resolvable:$true] %s368_s14 }
  0x2d   : > { %v349_v37 = vunpack.c.0.s8 %v348_v36  ;;  %s370_s13 = sshll.u32 %s366_s10, 4  ;;  %s355_s15 = scalar_lea.sflag [#allocation4], %s729_s7  ;;  %s371_s13 = int_to_ptr.hbm [resolvable:$true] %s370_s13 }
  0x2e   : > { %s558_s29 = sshra.s32 %s371_s13, 4  ;;  %s564_s11 = scalar_lea.hbm %s795_s5, 16  ;;  %s559_s29 = int_to_ptr.hbm [resolvable:$true] %s558_s29 }
  0x2f   : > { %s560_s22 = scalar_lea.hbm %s559_s29, 8  ;;  %p565_p0 = scmp.lt.s32.totalorder %s559_s29, %s795_s5 }
  0x30   : > { %v246_v1 = vld.sshfl [vmem:[#allocation1] sm:$0xff pattern:$0x75316420]  ;;  %v247_v2 = vld.sshfl [vmem:[#allocation1 + $0x8] sm:$0xff pattern:$0x75316420]  ;;  %p561_p6 = scmp.ne.s32.totalorder %s559_s29, %s560_s22  ;;  %p566_p1 = scmp.lt.s32.totalorder %s564_s11, %s560_s22 }
  0x31   : > { %v251_v3 = vsel %vm250_vm0, %v246_v1, 0.0  ;;  %v252_v4 = vsel %vm250_vm0, %v247_v2, 0.0 }
  0x32   : > { %v253_v5 = vadd.f32 %v252_v4, %v251_v3  ;;  %p562_p9 = pnand %p561_p6, %p693_p11  ;;  %p567_p3 = por %p566_p1, %p565_p0 }
  0x34   : > { %254 = vadd.xlane.f32.xlu0 %v253_v5  ;;  %p563_p13 = pneg %p562_p9 }
  0x36   : > { %p568_p4 = pnand %p567_p3, %p563_p13 }
  0xa7   : > { %v255_v9 = vpop.xlane.xlu0 %254 }
  0xa8   : > { %v256_v10 = vmul.f32 0.00390625, %v255_v9 }
  0xaa   : > { %v262_v11 = vperm.slane %v256_v10, %v261_v8 }
  0xac   : > { %451 = vmatmul.msk.f32.vlgmr.msra.gmra.mxu0 %vm263_vm1, %v262_v11 }
 0x129   : > { %v286_v14 = vpop.f32.mrf.mxu0 }
 0x12a   : > { %v287_v15 = vadd.f32 %v286_v14, %v258_v13 }
 0x12c   : > { %v289_v16 = vmax.f32 %v287_v15, 0.0 }
 0x12e   : > { %453 = vmatmul.msk.f32.vlgmr.msra.gmra.mxu1 %vm292_vm3, %v289_v16 }
 0x1ab   : > { %v317_v19 = vpop.f32.mrf.mxu1 }
 0x1ac   : > { %v318_v20 = vadd.f32 %v317_v19, %v291_v18 }
 0x1ae   : > { %v454_v21 = vmul.f32 -1.442695, %v318_v20 }
 0x1b0   : > { %510 = vpow2.f32 %v454_v21 }
 0x1b6   : > { %v511_v22 = vpop.eup %510 }
 0x1b7   : > { %v323_v23 = vadd.f32 1.0, %v511_v22 }
 0x1b9   : > { %512 = vrcp.f32 %v323_v23  ;;  %v335_v27 = vand.u32 2147483648, %v323_v23  ;;  %v333_v29 = vand.u32 2147483647, %v323_v23  ;;  %vm329_vm5 = vweird.f32 %v323_v23 }
 0x1bb   : > { %v336_v31 = vor.u32 1.1754944e-38, %v335_v27  ;;  %vm334_vm7 = vcmp.eq.f32.partialorder %v333_v29, 8.507059e+37 }
 0x1bf   : > { %v513_v24 = vpop.eup %512 }
 0x1c0   : > { %v325_v25 = vmul.f32 %v513_v24, %v323_v23  ;;  %vm330_vm4 = vweird.f32 %v513_v24 }
 0x1c1   : > { %vm331_vm6 = vmor %vm329_vm5, %vm330_vm4 }
 0x1c2   : > { %v326_v26 = vsub.f32 1.0, %v325_v25 }
 0x1c4   : > { %v327_v28 = vmul.f32 %v513_v24, %v326_v26 }
 0x1c6   : > { %v328_v30 = vadd.f32 %v513_v24, %v327_v28 }
 0x1c8   : > { %v332_v32 = vsel %vm331_vm6, %v513_v24, %v328_v30 }
 0x1c9   : > { %v337_v33 = vsel %vm334_vm7, %v336_v31, %v332_v32 }
 0x1ca   : > { %v339_v34 = vperm.slane %v337_v33, 0 }
 0x1cc   : > { %344 = vperm.xlu0 %509, %v339_v34  }
 0x23e   : > { %v345_v38 = vpop.permute.xlu0 %344 }
 0x23f   : > { %v350_v39 = vperm.slane %v345_v38, %v349_v37 }
 0x241   : > { %v352_v40 = vmul.f32 %v350_v39, %v739_v0 }
 0x243   : > { %353 = vst [vmem:[%s242_s12] sm:$0xff] %v352_v40 }
 0x244   : > { %571 = shalt.err (!%p568_p4)
}
 0x245   : > { %464 = dma.vmem_to_hbm [thread:$0]  (%p693_p11), %s369_s14, 128, %s371_s13, %s355_s15  }
 0x246 PF: > { %s382_s7 = sand.u32 1, %s598_s18   ;;  %p801_p7 = scmp.ge.s32.totalorder %s610_s21, 2 }
 0x247   : > { %s383_s26 = scalar_lea.sflag [#allocation4], %s382_s7 }
 0x248   : > { %p471_p5 = pnand %p801_p7, %p697_p12 }
 0x24a   : > { %p472_p8 = pneg %p471_p5 }
 0x24c   : > { %593 = dma.done.wait (%p472_p8), %s383_s26, 128  }
 0x24d   : > { %595 = vsyncadd (%p472_p8), %s383_s26, 4294967168  ;;  %p18_p10 = scmp.ge.s32.totalorder %s668_s24, 4   ;;  %s802_s18 = smov %s602_s19 }
 0x24e   : > { %s803_s19 = smov %s606_s20  ;;  %s804_s20 = smov %s680_s27 }
 0x24f   : > { %s805_s21 = smov %s668_s24  ;;  %20 = sbr.rel (!%p18_p10) target bundleno = 5 (0x5), region = 85 }
 0x254   :  { %389 = vsyncpa [#allocation3], 1 }
 0x255   :  { %391 = vsyncpa [#allocation3 + $0x1], 1 }
 0x256   :  { %392 = vsyncpa [#allocation4], 1 }
 0x257   :  { %394 = vsyncpa [#allocation4 + $0x1], 1 }

</bundles_post_ra>
